<compile_context>
chip_gen: v6e
topology: v6e:2x2x1
jax: 0.10.0
libtpu: 0.0.40
codegen_flags: <defaults>
</compile_context>

<pallas_src>
import jax
import jax.numpy as jnp
from jax.experimental import pallas as pl
from jax.experimental.pallas import tpu as pltpu


def _round_up(a, b):
    return (a + b - 1) // b * b


def _make_kernel(num_hidden):
    """Kernel factory; num_hidden = hidden_layers - 1 (may be 0)."""

    def kernel(xr_ref, f_ref, w1s_ref, w1c_ref, b1_ref, *rest):
        if num_hidden > 0:
            wh_ref, bh_ref, wo_ref, bo_ref, out_ref = rest
        else:
            wh_ref = bh_ref = None
            wo_ref, bo_ref, out_ref = rest

        # Positional-encoding projection, exact f32 on the VPU:
        #   x_proj[f*Fin + c, r] = freqs[f] * x[c, r]
        # xr_ref is x already replicated num_freqs times along sublanes
        # (layout plumbing done in the wrapper); f_ref is the (NF*Fin, 1)
        # frequency column.
        x_proj = xr_ref[...] * f_ref[...]                       # (NF*Fin, TM)

        # First linear, split into sin/cos halves (no misaligned concat):
        #   h = W1_sin^T @ sin(x_proj) + W1_cos^T @ cos(x_proj) + b1
        h = (jnp.dot(w1s_ref[...], jnp.sin(x_proj),
                     preferred_element_type=jnp.float32)
             + jnp.dot(w1c_ref[...], jnp.cos(x_proj),
                       preferred_element_type=jnp.float32)
             + b1_ref[...])
        h = jnp.maximum(h, 0.0)

        # Hidden linears + ReLU (static unrolled; hidden_layers is small).
        for i in range(num_hidden):
            h = jnp.dot(wh_ref[i], h, preferred_element_type=jnp.float32) + bh_ref[i]
            h = jnp.maximum(h, 0.0)

        # Output linear: (d_out, H) @ (H, TM) -> (d_out, TM)
        out = jnp.dot(wo_ref[...], h, preferred_element_type=jnp.float32) + bo_ref[...]

        # Heads: rows 0..d_out-2 -> sigmoid (rgb); row d_out-1 -> softplus (sigma).
        # Row-mask select keeps the single lane-dense store.
        row = jax.lax.broadcasted_iota(jnp.int32, out.shape, 0)
        rgb = jax.nn.sigmoid(out)
        sigma = jnp.where(out > 20.0, out, jnp.log1p(jnp.exp(out)))
        out_ref[...] = jnp.where(row == out.shape[0] - 1, sigma, rgb)

    return kernel


def simple_nerf_pallas(x, params, *, tile_rows=512):
    """x: (num_rays, num_samples, in_features) float32.

    Returns (rgb, sigma) with shapes
      rgb:   (num_rays, num_samples, out_features - 1)
      sigma: (num_rays, num_samples)
    """
    num_rays, num_samples, in_features = x.shape
    n = num_rays * num_samples

    freqs = params["freqs"]
    num_freqs = freqs.shape[0]
    d_pe_half = num_freqs * in_features

    w1, b1 = params["w1"], params["b1"]          # (2*NF*Fin, H), (1, H)
    wh, bh = params["wh"], params["bh"]          # (L-1, H, H), (L-1, 1, H)
    wo, bo = params["wo"], params["bo"]          # (H, Dout),    (1, Dout)

    hidden = w1.shape[1]
    n_hidden = wh.shape[0]
    d_out = wo.shape[1]

    # ---- row tiling: multiple of 128 lanes, padded final tile ----------------
    tm = max(128, min(_round_up(tile_rows, 128), _round_up(n, 128)))
    n_pad = _round_up(n, tm)
    grid = (n_pad // tm,)

    # ---- wrapper-side layout plumbing (rows -> lanes) ------------------------
    x2 = x.reshape(n, in_features).astype(jnp.float32)
    if n_pad != n:
        x2 = jnp.concatenate(
            [x2, jnp.zeros((n_pad - n, in_features), jnp.float32)], axis=0)
    xt = x2.T                                           # (Fin, Np)
    x_rep = jnp.tile(xt, (num_freqs, 1))                # (NF*Fin, Np)

    f_col = jnp.repeat(freqs.astype(jnp.float32), in_features).reshape(d_pe_half, 1)

    w1s_t = w1[:d_pe_half].T                            # (H, NF*Fin)
    w1c_t = w1[d_pe_half:].T                            # (H, NF*Fin)
    b1_t = b1.reshape(hidden, 1)                        # (H, 1)
    wo_t = wo.T                                         # (Dout, H)
    bo_t = bo.reshape(d_out, 1)                         # (Dout, 1)

    args = [x_rep, f_col, w1s_t, w1c_t, b1_t]
    in_specs = [
        pl.BlockSpec((d_pe_half, tm), lambda i: (0, i)),
        pl.BlockSpec((d_pe_half, 1), lambda i: (0, 0)),
        pl.BlockSpec((hidden, d_pe_half), lambda i: (0, 0)),
        pl.BlockSpec((hidden, d_pe_half), lambda i: (0, 0)),
        pl.BlockSpec((hidden, 1), lambda i: (0, 0)),
    ]
    if n_hidden > 0:
        wh_t = jnp.transpose(wh, (0, 2, 1))             # (L-1, H, H)
        bh_t = jnp.transpose(bh, (0, 2, 1))             # (L-1, H, 1)
        args += [wh_t, bh_t]
        in_specs += [
            pl.BlockSpec((n_hidden, hidden, hidden), lambda i: (0, 0, 0)),
            pl.BlockSpec((n_hidden, hidden, 1), lambda i: (0, 0, 0)),
        ]
    args += [wo_t, bo_t]
    in_specs += [
        pl.BlockSpec((d_out, hidden), lambda i: (0, 0)),
        pl.BlockSpec((d_out, 1), lambda i: (0, 0)),
    ]

    # ---- advisory cost estimate for the XLA scheduler ------------------------
    flops = int(2 * n_pad * (2 * hidden * d_pe_half
                             + n_hidden * hidden * hidden
                             + hidden * d_out))
    transcendentals = int(n_pad * (2 * d_pe_half + d_out + 2))
    bytes_accessed = int(4 * (n_pad * (d_pe_half + d_out)
                              + d_pe_half
                              + 2 * hidden * d_pe_half + hidden
                              + n_hidden * hidden * (hidden + 1)
                              + d_out * (hidden + 1)))

    out_t = pl.pallas_call(
        _make_kernel(n_hidden),
        out_shape=jax.ShapeDtypeStruct((d_out, n_pad), jnp.float32),
        grid_spec=pltpu.PrefetchScalarGridSpec(
            num_scalar_prefetch=0,
            grid=grid,
            in_specs=in_specs,
            out_specs=pl.BlockSpec((d_out, tm), lambda i: (0, i)),
        ),
        compiler_params=pltpu.CompilerParams(
            dimension_semantics=("parallel",),
        ),
        cost_estimate=pl.CostEstimate(
            flops=flops,
            transcendentals=transcendentals,
            bytes_accessed=bytes_accessed,
        ),
    )(*args)

    out = out_t.T[:n].reshape(num_rays, num_samples, d_out)
    rgb = out[..., :-1]
    sigma = out[..., -1]
    return rgb, sigma


def init_params(key, in_features, max_freq, num_freqs, hidden_features,
                hidden_layers, out_features):
    """Deterministic parameter init mirroring the PyTorch module's shapes."""
    freqs = 2.0 ** jnp.linspace(0.0, float(max_freq), num_freqs)  # (NF,)
    d_pe = 2 * num_freqs * in_features

    def linear(key, fan_in, fan_out):
        kw, kb = jax.random.split(key)
        bound = 1.0 / jnp.sqrt(float(fan_in))
        w = jax.random.uniform(kw, (fan_in, fan_out), jnp.float32, -bound, bound)
        b = jax.random.uniform(kb, (1, fan_out), jnp.float32, -bound, bound)
        return w, b

    keys = jax.random.split(key, hidden_layers + 1)
    w1, b1 = linear(keys[0], d_pe, hidden_features)

    wh_list, bh_list = [], []
    for i in range(hidden_layers - 1):
        w, b = linear(keys[1 + i], hidden_features, hidden_features)
        wh_list.append(w)
        bh_list.append(b[None, :, :])  # (1, 1, H)
    wh = jnp.stack(wh_list, axis=0) if wh_list else jnp.zeros(
        (0, hidden_features, hidden_features), jnp.float32)
    bh = jnp.concatenate(bh_list, axis=0) if bh_list else jnp.zeros(
        (0, 1, hidden_features), jnp.float32)

    wo, bo = linear(keys[-1], hidden_features, out_features)

    return {
        "w1": w1, "b1": b1,
        "wh": wh, "bh": bh,
        "wo": wo, "bo": bo,
        "freqs": freqs,
    }


def simple_nerf_reference(x, params):
    """Pure-JAX reference matching the PyTorch forward (for a sanity check)."""
    freqs = params["freqs"]
    x_proj = x[..., None, :] * freqs[:, None]                 # (..., NF, Fin)
    x_proj = x_proj.reshape(*x.shape[:-1], -1)                # (..., NF*Fin)
    pe = jnp.concatenate([jnp.sin(x_proj), jnp.cos(x_proj)], axis=-1)

    h = jnp.maximum(pe @ params["w1"] + params["b1"][0], 0.0)
    for i in range(params["wh"].shape[0]):
        h = jnp.maximum(h @ params["wh"][i] + params["bh"][i, 0], 0.0)
    out = h @ params["wo"] + params["bo"][0]
    rgb = jax.nn.sigmoid(out[..., :-1])
    sigma = jnp.where(out[..., -1] > 20.0, out[..., -1],
                      jnp.log1p(jnp.exp(out[..., -1])))
    return rgb, sigma


if __name__ == "__main__":
    # Small shapes consistent with the module's forward contract.
    in_features = 3
    max_freq = 4
    num_freqs = 6
    hidden_features = 32
    hidden_layers = 3
    out_features = 4

    num_rays, num_samples = 4, 16

    key = jax.random.PRNGKey(0)
    k_params, k_x = jax.random.split(key)

    params = init_params(k_params, in_features, max_freq, num_freqs,
                         hidden_features, hidden_layers, out_features)
    x = jax.random.normal(k_x, (num_rays, num_samples, in_features), jnp.float32)

    rgb, sigma = simple_nerf_pallas(x, params)
    rgb = jax.block_until_ready(rgb)
    sigma = jax.block_until_ready(sigma)

    # Quiet correctness check against the pure-JAX reference.
    rgb_ref, sigma_ref = simple_nerf_reference(x, params)
    assert rgb.shape == (num_rays, num_samples, out_features - 1)
    assert sigma.shape == (num_rays, num_samples)
    assert jnp.allclose(rgb, rgb_ref, atol=1e-4, rtol=1e-4)
    assert jnp.allclose(sigma, sigma_ref, atol=1e-4, rtol=1e-4)

    print("KERNEL_OK")
</pallas_src>

<mosaic_0001>
module attributes {stable_mosaic.version = 11 : i64} {
  func.func @kernel(%arg0: i32, %arg1: memref<18x128xf32, #tpu.memory_space<vmem>>, %arg2: memref<18x1xf32, #tpu.memory_space<vmem>>, %arg3: memref<32x18xf32, #tpu.memory_space<vmem>>, %arg4: memref<32x18xf32, #tpu.memory_space<vmem>>, %arg5: memref<32x1xf32, #tpu.memory_space<vmem>>, %arg6: memref<2x32x32xf32, #tpu.memory_space<vmem>>, %arg7: memref<2x32x1xf32, #tpu.memory_space<vmem>>, %arg8: memref<4x32xf32, #tpu.memory_space<vmem>>, %arg9: memref<4x1xf32, #tpu.memory_space<vmem>>, %arg10: memref<4x128xf32, #tpu.memory_space<vmem>>) attributes {dimension_semantics = [#tpu.dimension_semantics<parallel>], iteration_bounds = array<i64: 1>, scalar_prefetch = 0 : i64, scratch_operands = 0 : i64, tpu.core_type = #tpu.core_type<tc>, window_params = [{transform_indices = @transform_0, window_bounds = array<i64: 18, 128>}, {pipeline_mode = #tpu.pipeline_mode<synchronous>, transform_indices = @transform_1, window_bounds = array<i64: 18, 1>}, {pipeline_mode = #tpu.pipeline_mode<synchronous>, transform_indices = @transform_2, window_bounds = array<i64: 32, 18>}, {pipeline_mode = #tpu.pipeline_mode<synchronous>, transform_indices = @transform_3, window_bounds = array<i64: 32, 18>}, {pipeline_mode = #tpu.pipeline_mode<synchronous>, transform_indices = @transform_4, window_bounds = array<i64: 32, 1>}, {pipeline_mode = #tpu.pipeline_mode<synchronous>, transform_indices = @transform_5, window_bounds = array<i64: 2, 32, 32>}, {pipeline_mode = #tpu.pipeline_mode<synchronous>, transform_indices = @transform_6, window_bounds = array<i64: 2, 32, 1>}, {pipeline_mode = #tpu.pipeline_mode<synchronous>, transform_indices = @transform_7, window_bounds = array<i64: 4, 32>}, {pipeline_mode = #tpu.pipeline_mode<synchronous>, transform_indices = @transform_8, window_bounds = array<i64: 4, 1>}, {transform_indices = @transform_9, window_bounds = array<i64: 4, 128>}]} {
    %c0 = arith.constant 0 : index
    %c0_0 = arith.constant 0 : index
    %0 = vector.load %arg1[%c0, %c0_0] : memref<18x128xf32, #tpu.memory_space<vmem>>, vector<18x128xf32>
    %c0_1 = arith.constant 0 : index
    %c0_2 = arith.constant 0 : index
    %1 = vector.load %arg2[%c0_1, %c0_2] : memref<18x1xf32, #tpu.memory_space<vmem>>, vector<18x1xf32>
    %2 = vector.broadcast %1 : vector<18x1xf32> to vector<18x128xf32>
    %3 = arith.mulf %0, %2 : vector<18x128xf32>
    %c0_3 = arith.constant 0 : index
    %c0_4 = arith.constant 0 : index
    %4 = vector.load %arg3[%c0_3, %c0_4] : memref<32x18xf32, #tpu.memory_space<vmem>>, vector<32x18xf32>
    %5 = math.sin %3 : vector<18x128xf32>
    %cst = arith.constant dense<0.000000e+00> : vector<32x128xf32>
    %6 = tpu.matmul %4, %5, %cst {dimension_numbers = #tpu.dot_dimension_numbers<[1], [0], [0], [1], [0, 0, 1, 1], [], []>} : vector<32x18xf32>, vector<18x128xf32>, vector<32x128xf32> -> vector<32x128xf32>
    %c0_5 = arith.constant 0 : index
    %c0_6 = arith.constant 0 : index
    %7 = vector.load %arg4[%c0_5, %c0_6] : memref<32x18xf32, #tpu.memory_space<vmem>>, vector<32x18xf32>
    %8 = math.cos %3 : vector<18x128xf32>
    %cst_7 = arith.constant dense<0.000000e+00> : vector<32x128xf32>
    %9 = tpu.matmul %7, %8, %cst_7 {dimension_numbers = #tpu.dot_dimension_numbers<[1], [0], [0], [1], [0, 0, 1, 1], [], []>} : vector<32x18xf32>, vector<18x128xf32>, vector<32x128xf32> -> vector<32x128xf32>
    %10 = arith.addf %6, %9 : vector<32x128xf32>
    %c0_8 = arith.constant 0 : index
    %c0_9 = arith.constant 0 : index
    %11 = vector.load %arg5[%c0_8, %c0_9] : memref<32x1xf32, #tpu.memory_space<vmem>>, vector<32x1xf32>
    %12 = vector.broadcast %11 : vector<32x1xf32> to vector<32x128xf32>
    %13 = arith.addf %10, %12 : vector<32x128xf32>
    %cst_10 = arith.constant 0.000000e+00 : f32
    %14 = vector.broadcast %cst_10 : f32 to vector<32x128xf32>
    %15 = arith.maximumf %13, %14 : vector<32x128xf32>
    %c0_11 = arith.constant 0 : index
    %c0_12 = arith.constant 0 : index
    %c0_13 = arith.constant 0 : index
    %16 = vector.load %arg6[%c0_11, %c0_12, %c0_13] : memref<2x32x32xf32, #tpu.memory_space<vmem>>, vector<1x32x32xf32>
    %17 = vector.shape_cast %16 : vector<1x32x32xf32> to vector<32x32xf32>
    %cst_14 = arith.constant dense<0.000000e+00> : vector<32x128xf32>
    %18 = tpu.matmul %17, %15, %cst_14 {dimension_numbers = #tpu.dot_dimension_numbers<[1], [0], [0], [1], [0, 0, 1, 1], [], []>} : vector<32x32xf32>, vector<32x128xf32>, vector<32x128xf32> -> vector<32x128xf32>
    %c0_15 = arith.constant 0 : index
    %c0_16 = arith.constant 0 : index
    %c0_17 = arith.constant 0 : index
    %19 = vector.load %arg7[%c0_15, %c0_16, %c0_17] : memref<2x32x1xf32, #tpu.memory_space<vmem>>, vector<1x32x1xf32>
    %20 = vector.shape_cast %19 : vector<1x32x1xf32> to vector<32x1xf32>
    %21 = vector.broadcast %20 : vector<32x1xf32> to vector<32x128xf32>
    %22 = arith.addf %18, %21 : vector<32x128xf32>
    %cst_18 = arith.constant 0.000000e+00 : f32
    %23 = vector.broadcast %cst_18 : f32 to vector<32x128xf32>
    %24 = arith.maximumf %22, %23 : vector<32x128xf32>
    %c1 = arith.constant 1 : index
    %c0_19 = arith.constant 0 : index
    %c0_20 = arith.constant 0 : index
    %25 = vector.load %arg6[%c1, %c0_19, %c0_20] : memref<2x32x32xf32, #tpu.memory_space<vmem>>, vector<1x32x32xf32>
    %26 = vector.shape_cast %25 : vector<1x32x32xf32> to vector<32x32xf32>
    %cst_21 = arith.constant dense<0.000000e+00> : vector<32x128xf32>
    %27 = tpu.matmul %26, %24, %cst_21 {dimension_numbers = #tpu.dot_dimension_numbers<[1], [0], [0], [1], [0, 0, 1, 1], [], []>} : vector<32x32xf32>, vector<32x128xf32>, vector<32x128xf32> -> vector<32x128xf32>
    %c1_22 = arith.constant 1 : index
    %c0_23 = arith.constant 0 : index
    %c0_24 = arith.constant 0 : index
    %28 = vector.load %arg7[%c1_22, %c0_23, %c0_24] : memref<2x32x1xf32, #tpu.memory_space<vmem>>, vector<1x32x1xf32>
    %29 = vector.shape_cast %28 : vector<1x32x1xf32> to vector<32x1xf32>
    %30 = vector.broadcast %29 : vector<32x1xf32> to vector<32x128xf32>
    %31 = arith.addf %27, %30 : vector<32x128xf32>
    %cst_25 = arith.constant 0.000000e+00 : f32
    %32 = vector.broadcast %cst_25 : f32 to vector<32x128xf32>
    %33 = arith.maximumf %31, %32 : vector<32x128xf32>
    %c0_26 = arith.constant 0 : index
    %c0_27 = arith.constant 0 : index
    %34 = vector.load %arg8[%c0_26, %c0_27] : memref<4x32xf32, #tpu.memory_space<vmem>>, vector<4x32xf32>
    %cst_28 = arith.constant dense<0.000000e+00> : vector<4x128xf32>
    %35 = tpu.matmul %34, %33, %cst_28 {dimension_numbers = #tpu.dot_dimension_numbers<[1], [0], [0], [1], [0, 0, 1, 1], [], []>} : vector<4x32xf32>, vector<32x128xf32>, vector<4x128xf32> -> vector<4x128xf32>
    %c0_29 = arith.constant 0 : index
    %c0_30 = arith.constant 0 : index
    %36 = vector.load %arg9[%c0_29, %c0_30] : memref<4x1xf32, #tpu.memory_space<vmem>>, vector<4x1xf32>
    %37 = vector.broadcast %36 : vector<4x1xf32> to vector<4x128xf32>
    %38 = arith.addf %35, %37 : vector<4x128xf32>
    %39 = tpu.iota {dimensions = array<i32: 0>} : vector<4x128xi32>
    %40 = arith.negf %38 : vector<4x128xf32>
    %41 = math.exp %40 : vector<4x128xf32>
    %cst_31 = arith.constant 1.000000e+00 : f32
    %42 = vector.broadcast %cst_31 : f32 to vector<4x128xf32>
    %43 = arith.addf %42, %41 : vector<4x128xf32>
    %44 = arith.divf %42, %43 : vector<4x128xf32>
    %cst_32 = arith.constant 2.000000e+01 : f32
    %45 = vector.broadcast %cst_32 : f32 to vector<4x128xf32>
    %46 = arith.cmpf ogt, %38, %45 : vector<4x128xf32>
    %47 = math.exp %38 : vector<4x128xf32>
    %48 = math.log1p %47 : vector<4x128xf32>
    %49 = arith.select %46, %38, %48 : vector<4x128xi1>, vector<4x128xf32>
    %c3_i32 = arith.constant 3 : i32
    %50 = vector.broadcast %c3_i32 : i32 to vector<4x128xi32>
    %51 = arith.cmpi eq, %39, %50 : vector<4x128xi32>
    %52 = arith.select %51, %49, %44 : vector<4x128xi1>, vector<4x128xf32>
    %c0_33 = arith.constant 0 : index
    %c0_34 = arith.constant 0 : index
    %53 = vector.load %arg10[%c0_33, %c0_34] : memref<4x128xf32, #tpu.memory_space<vmem>>, vector<4x128xf32>
    tpu.vector_store %arg10[%c0_33, %c0_34], %52 {strides = array<i32>} : memref<4x128xf32, #tpu.memory_space<vmem>>, vector<4x128xf32>,
    return
  }
  func.func @transform_0(%arg0: i32) -> (i32, i32) {
    %c0_i32 = arith.constant 0 : i32
    %c0_i32_0 = arith.constant 0 : i32
    return %c0_i32, %arg0 : i32, i32
  }
  func.func @transform_1(%arg0: i32) -> (i32, i32) {
    %c0_i32 = arith.constant 0 : i32
    %c0_i32_0 = arith.constant 0 : i32
    %c0_i32_1 = arith.constant 0 : i32
    return %c0_i32, %c0_i32_0 : i32, i32
  }
  func.func @transform_2(%arg0: i32) -> (i32, i32) {
    %c0_i32 = arith.constant 0 : i32
    %c0_i32_0 = arith.constant 0 : i32
    %c0_i32_1 = arith.constant 0 : i32
    return %c0_i32, %c0_i32_0 : i32, i32
  }
  func.func @transform_3(%arg0: i32) -> (i32, i32) {
    %c0_i32 = arith.constant 0 : i32
    %c0_i32_0 = arith.constant 0 : i32
    %c0_i32_1 = arith.constant 0 : i32
    return %c0_i32, %c0_i32_0 : i32, i32
  }
  func.func @transform_4(%arg0: i32) -> (i32, i32) {
    %c0_i32 = arith.constant 0 : i32
    %c0_i32_0 = arith.constant 0 : i32
    %c0_i32_1 = arith.constant 0 : i32
    return %c0_i32, %c0_i32_0 : i32, i32
  }
  func.func @transform_5(%arg0: i32) -> (i32, i32, i32) {
    %c0_i32 = arith.constant 0 : i32
    %c0_i32_0 = arith.constant 0 : i32
    %c0_i32_1 = arith.constant 0 : i32
    %c0_i32_2 = arith.constant 0 : i32
    return %c0_i32, %c0_i32_0, %c0_i32_1 : i32, i32, i32
  }
  func.func @transform_6(%arg0: i32) -> (i32, i32, i32) {
    %c0_i32 = arith.constant 0 : i32
    %c0_i32_0 = arith.constant 0 : i32
    %c0_i32_1 = arith.constant 0 : i32
    %c0_i32_2 = arith.constant 0 : i32
    return %c0_i32, %c0_i32_0, %c0_i32_1 : i32, i32, i32
  }
  func.func @transform_7(%arg0: i32) -> (i32, i32) {
    %c0_i32 = arith.constant 0 : i32
    %c0_i32_0 = arith.constant 0 : i32
    %c0_i32_1 = arith.constant 0 : i32
    return %c0_i32, %c0_i32_0 : i32, i32
  }
  func.func @transform_8(%arg0: i32) -> (i32, i32) {
    %c0_i32 = arith.constant 0 : i32
    %c0_i32_0 = arith.constant 0 : i32
    %c0_i32_1 = arith.constant 0 : i32
    return %c0_i32, %c0_i32_0 : i32, i32
  }
  func.func @transform_9(%arg0: i32) -> (i32, i32) {
    %c0_i32 = arith.constant 0 : i32
    %c0_i32_0 = arith.constant 0 : i32
    return %c0_i32, %arg0 : i32, i32
  }
}

</mosaic_0001>

<bundles_post_ra>
// kernel: tpu_custom_call.1
= control target key start
LH: loop header
LB: loop body
LE: loop exit
PB: predicated region body
PF: predicated region fallthrough
CT: control target
= control target key end

     0   :  { %v1515_v2 = vmov 0   ;;  %s1963_s0 = inlined_call_operand.vmem [shape: f32[18,128], index: 0, kind: input, shape index: {}]   ;;  %s1964_s1 = inlined_call_operand.vmem [shape: f32[18,1], index: 1, kind: input, shape index: {}]   ;;  %s1965_s2 = inlined_call_operand.vmem [shape: f32[32,18], index: 2, kind: input, shape index: {}]   ;;  %s1966_s3 = inlined_call_operand.vmem [shape: f32[32,18], index: 3, kind: input, shape index: {}]   ;;  %s1967_s4 = inlined_call_operand.vmem [shape: f32[32,1], index: 4, kind: input, shape index: {}]   ;;  %s1968_s5 = inlined_call_operand.vmem [shape: f32[2,32,32], index: 5, kind: input, shape index: {}]   ;;  %s1969_s6 = inlined_call_operand.vmem [shape: f32[2,32,1], index: 6, kind: input, shape index: {}]   ;;  %s1970_s7 = inlined_call_operand.vmem [shape: f32[4,32], index: 7, kind: input, shape index: {}]   ;;  %s1971_s8 = inlined_call_operand.vmem [shape: f32[4,1], index: 8, kind: input, shape index: {}]   ;;  %s1972_s9 = inlined_call_operand.hbm [shape: f32[4,128], index: 9, kind: output, shape index: {}]  }
   0x1   :  { %v38_v0 = vld [vmem:[%s1964_s1 + $0x10] sm:$0x3]  ;;  %v36_v1 = vld [vmem:[%s1964_s1] sm:$0xff]  ;;  %1472 = vset.pattern.permute.xlu1 %v1515_v2  ;;  %1471 = vset.pattern.permute.xlu0 %v1515_v2  ;;  %v37_v3 = vld [vmem:[%s1964_s1 + $0x8] sm:$0xff] }
   0x2   :  { %51 = vperm.xlu0 %1471, %v38_v0   ;;  %41 = vperm.xlu1 %1472, %v36_v1   ;;  %v891_v4 = vld [vmem:[%s1967_s4 + $0x18] sm:$0xff] }
   0x6   :  { %46 = vperm.xlu0 %1471, %v37_v3   ;;  %909 = vperm.xlu1 %1472, %v891_v4  }
   0x7   :  { %14 = vsyncpa [#allocation3], 0  ;;  %v890_v5 = vld [vmem:[%s1967_s4 + $0x10] sm:$0xff]  ;;  %v889_v6 = vld [vmem:[%s1967_s4 + $0x8] sm:$0xff]  ;;  %vm1973_vm0 = vcmask 146432  }
   0x8   :  { %v888_v7 = vld [vmem:[%s1967_s4] sm:$0xff]  ;;  %v927_v8 = vld [vmem:[%s1969_s6 + $0x18] sm:$0xff]  ;;  %v926_v9 = vld [vmem:[%s1969_s6 + $0x10] sm:$0xff]  ;;  %v1516_v58 = vmov 683565275  }
   0x9   :  { %v925_v10 = vld [vmem:[%s1969_s6 + $0x8] sm:$0xff]  ;;  %v924_v11 = vld [vmem:[%s1969_s6] sm:$0xff]  ;;  %v1344_v12 = vld [vmem:[%s1969_s6 + $0x38] sm:$0xff]  ;;  %v1517_v60 = vmov 2475754826  }
   0xa   :  { %904 = vperm.xlu0 %1471, %v890_v5   ;;  %899 = vperm.xlu1 %1472, %v889_v6   ;;  %v1343_v13 = vld [vmem:[%s1969_s6 + $0x30] sm:$0xff]  ;;  %v1342_v14 = vld [vmem:[%s1969_s6 + $0x28] sm:$0xff]  ;;  %v1341_v15 = vld [vmem:[%s1969_s6 + $0x20] sm:$0xff]  ;;  %v1518_v62 = vmov 2131351028  }
   0xb   :  { %v1182_v16 = vld [vmem:[%s1971_s8] sm:$0xf]  ;;  %v35_v19 = vld [vmem:[%s1963_s0 + $0x10] sm:$0x3]  ;;  %v34_v25 = vld [vmem:[%s1963_s0 + $0x8] sm:$0xff] }
   0xc   :  { %v373_v17 = vld [vmem:[%s1966_s3] sm:$0xff]  ;;  %v1519_v0 = vmov 920167782   ;;  %v1520_v2 = vmov 2102212464  }
   0xd   :  { %v57_v18 = vld [vmem:[%s1965_s2] sm:$0xff]  ;;  %1392 = vmatprep.mubr.msk.f32.mxu0 %vm1973_vm0, %v373_v17 }
   0xe   :  { %894 = vperm.xlu0 %1471, %v888_v7   ;;  %945 = vperm.xlu1 %1472, %v927_v8   ;;  %v33_v20 = vld [vmem:[%s1963_s0] sm:$0xff] }
   0xf   :  { %1404 = vmatprep.mubr.msk.f32.mxu1 %vm1973_vm0, %v57_v18 }
  0x12   :  { %940 = vperm.xlu0 %1471, %v926_v9   ;;  %935 = vperm.xlu1 %1472, %v925_v10  }
  0x16   :  { %930 = vperm.xlu0 %1471, %v924_v11   ;;  %1077 = vperm.xlu1 %1472, %v1344_v12  }
  0x1a   :  { %1072 = vperm.xlu0 %1471, %v1343_v13   ;;  %1067 = vperm.xlu1 %1472, %v1342_v14   ;;  %v1521_v13 = vmov 1326507024  }
  0x1e   :  { %1062 = vperm.xlu0 %1471, %v1341_v15   ;;  %1185 = vperm.xlu1 %1472, %v1182_v16  }
  0x7d   :  { %v52_v21 = vpop.permute.xlu0 %51  ;;  %v42_v22 = vpop.permute.xlu1 %41 }
  0x7e   :  { %v1637_v23 = vmul.f32 %v52_v21, %v35_v19  ;;  %v1639_v24 = vmul.f32 %v42_v22, %v33_v20 }
  0x80   :  { %v272_v26 = vand.u32 2139095040, %v1637_v23  ;;  %v61_v27 = vand.u32 2147483647, %v1639_v24  ;;  %v64_v28 = vand.u32 2139095040, %v1639_v24  ;;  %v269_v34 = vand.u32 2147483647, %v1637_v23 }
  0x81   :  { %v47_v29 = vpop.permute.xlu0 %46 }
  0x82   :  { %v273_v30 = vshrl.u32 %v272_v26, 23  ;;  %v65_v31 = vshrl.u32 %v64_v28, 23  ;;  %v1647_v32 = vmul.f32 %v47_v29, %v34_v25  ;;  %v68_v33 = vand.u32 8388607, %v61_v27 }
  0x83   :  { %v1658_v44 = vand.u32 8388607, %v269_v34 }
  0x84   :  { %v1307_v35 = vadd.s32 4294967169, %v273_v30  ;;  %v1299_v36 = vadd.s32 4294967169, %v65_v31  ;;  %v165_v37 = vand.u32 2147483647, %v1647_v32  ;;  %v168_v38 = vand.u32 2139095040, %v1647_v32 }
  0x85   :  { %v69_v42 = vor.u32 8388608, %v68_v33  ;;  %v277_v52 = vor.u32 8388608, %v1658_v44 }
  0x86   :  { %v279_v39 = vadd.s32 1, %v1307_v35  ;;  %v71_v40 = vadd.s32 1, %v1299_v36  ;;  %v172_v41 = vand.u32 8388607, %v165_v37  ;;  %v169_v43 = vshrl.u32 %v168_v38, 23 }
  0x87   :  { %v1662_v51 = vshll.u32 %v69_v42, 8 }
  0x88   :  { %vm280_vm1 = vcmp.gt.s32.totalorder %v279_v39, 0  ;;  %vm72_vm2 = vcmp.gt.s32.totalorder %v71_v40, 0  ;;  %v1303_v47 = vadd.s32 4294967169, %v169_v43  ;;  %v173_v50 = vor.u32 8388608, %v172_v41 }
  0x89   :  { %v281_v45 = vsel %vm280_vm1, %v279_v39, 0  ;;  %v73_v46 = vsel %vm72_vm2, %v71_v40, 0 }
  0x8a   :  { %v1660_v48 = vand.u32 31, %v281_v45  ;;  %v75_v49 = vand.u32 31, %v73_v46  ;;  %v1665_v53 = vshrl.u32 %v281_v45, 5  ;;  %v74_v55 = vshrl.u32 %v73_v46, 5 }
  0x8b   :  { %v175_v56 = vadd.s32 1, %v1303_v47  ;;  %v1677_v5 = vshll.u32 %v173_v50, 8 }
  0x8c   :  { %v1668_v54 = vsub.s32 32, %v1660_v48  ;;  %v76_v57 = vsub.s32 32, %v75_v49  ;;  %v78_v59 = vshll.u32 %v1516_v58, %v75_v49  ;;  %v81_v61 = vshll.u32 %v1517_v60, %v75_v49 }
  0x8d   :  { %v84_v63 = vshll.u32 %v1518_v62, %v75_v49  ;;  %v87_v3 = vshll.u32 %v1520_v2, %v75_v49  ;;  %v90_v4 = vshll.u32 %v1519_v0, %v75_v49  ;;  %v295_v10 = vshll.u32 %v1520_v2, %v1660_v48 }
  0x8e   :  { %v296_v1 = vshrl.u32 %v1519_v0, %v1668_v54  ;;  %v77_v6 = vshrl.u32 %v1516_v58, %v76_v57  ;;  %v79_v7 = vshrl.u32 %v1517_v60, %v76_v57  ;;  %v82_v8 = vshrl.u32 %v1518_v62, %v76_v57 }
  0x8f   :  { %v85_v9 = vshrl.u32 %v1520_v2, %v76_v57  ;;  %v1687_v11 = vshll.u32 %v1519_v0, %v1660_v48  ;;  %v88_v12 = vshrl.u32 %v1519_v0, %v76_v57  ;;  %v91_v14 = vshrl.u32 %v1521_v13, %v76_v57 }
  0x90   :  { %v80_v15 = vor.u32 %v79_v7, %v78_v59  ;;  %v83_v16 = vor.u32 %v82_v8, %v81_v61  ;;  %vm93_vm3 = vcmp.lt.s32.totalorder %v74_v55, 1  ;;  %v1690_v18 = vor.u32 %v296_v1, %v295_v10 }
  0x91   :  { %v86_v17 = vor.u32 %v85_v9, %v84_v63  ;;  %v1693_v19 = vshrl.u32 %v1521_v13, %v1668_v54  ;;  %v89_v20 = vor.u32 %v88_v12, %v87_v3  ;;  %v92_v21 = vor.u32 %v91_v14, %v90_v4 }
  0x92   :  { %vm94_vm4 = vcmp.lt.s32.totalorder %v74_v55, 2  ;;  %vm95_vm5 = vcmp.lt.s32.totalorder %v74_v55, 3  ;;  %vm96_vm6 = vcmp.lt.s32.totalorder %v74_v55, 4  ;;  %v97_v22 = vsel %vm93_vm3, %v77_v6, %v80_v15 }
  0x93   :  { %v98_v25 = vsel %vm96_vm6, %v86_v17, 2102212464  ;;  %v101_v26 = vsel %vm93_vm3, %v80_v15, %v83_v16  ;;  %v102_v28 = vsel %vm96_vm6, %v89_v20, 920167782  ;;  %v105_v29 = vsel %vm93_vm3, %v83_v16, %v86_v17 }
  0x94   :  { %v99_v30 = vsel %vm95_vm5, %v83_v16, %v98_v25  ;;  %v103_v31 = vsel %vm95_vm5, %v86_v17, %v102_v28  ;;  %v106_v33 = vsel %vm96_vm6, %v92_v21, 1326507024  ;;  %vm176_vm7 = vcmp.gt.s32.totalorder %v175_v56, 0 }
  0x95   :  { %v100_v35 = vsel %vm94_vm4, %v97_v22, %v99_v30  ;;  %v104_v36 = vsel %vm94_vm4, %v101_v26, %v103_v31  ;;  %v107_v38 = vsel %vm95_vm5, %v89_v20, %v106_v33  ;;  %v177_v39 = vsel %vm176_vm7, %v175_v56, 0 }
  0x96   :  { %vm304_vm8 = vcmp.lt.s32.totalorder %v1665_v53, 4  ;;  %v108_v40 = vsel %vm94_vm4, %v105_v29, %v107_v38  ;;  %v1700_v41 = vmul.u32.u64.low %v1662_v51, %v104_v36  ;;  %v1701_v42 = vmul.u32.u64.high %v1662_v51, %v104_v36, %v1700_v41 }
  0x97   :  { %v1705_v43 = vmul.u32.u64.low %v1662_v51, %v108_v40  ;;  %v1706_v45 = vmul.u32.u64.high %v1662_v51, %v108_v40, %v1705_v43  ;;  %v178_v46 = vshrl.u32 %v177_v39, 5  ;;  %v179_v47 = vand.u32 31, %v177_v39 }
  0x98   :  { %v300_v49 = vor.u32 %v1693_v19, %v1687_v11  ;;  %v1713_v50 = vsel %vm304_vm8, %v1690_v18, 920167782  ;;  %v116_v55 = vmul.u32 %v1662_v51, %v100_v35  ;;  %v286_v56 = vshll.u32 %v1516_v58, %v1660_v48 }
  0x99   :  { %v180_v57 = vsub.s32 32, %v179_v47  ;;  %v182_v59 = vshll.u32 %v1516_v58, %v179_v47  ;;  %v185_v61 = vshll.u32 %v1517_v60, %v179_v47  ;;  %v287_v63 = vshrl.u32 %v1517_v60, %v1668_v54 }
  0x9a   :  { %v119_v1 = vadd.s32 1, %v1701_v42  ;;  %v188_v3 = vshll.u32 %v1518_v62, %v179_v47  ;;  %v191_v4 = vshll.u32 %v1520_v2, %v179_v47  ;;  %v194_v6 = vshll.u32 %v1519_v0, %v179_v47 }
  0x9b   :  { %vm118_vm9 = vc.u32 %v1706_v45, %v1700_v41  ;;  %v181_v51 = vshrl.u32 %v1516_v58, %v180_v57  ;;  %v183_v7 = vshrl.u32 %v1517_v60, %v180_v57  ;;  %vm197_vm10 = vcmp.lt.s32.totalorder %v178_v46, 1 }
  0x9c   :  { %v120_v8 = vsel %vm118_vm9, %v119_v1, %v1701_v42  ;;  %v186_v9 = vshrl.u32 %v1518_v62, %v180_v57  ;;  %v189_v10 = vshrl.u32 %v1520_v2, %v180_v57  ;;  %v192_v11 = vshrl.u32 %v1519_v0, %v180_v57 }
  0x9d   :  { %v121_v12 = vadd.s32 %v120_v8, %v116_v55  ;;  %v184_v14 = vor.u32 %v183_v7, %v182_v59  ;;  %v195_v15 = vshrl.u32 %v1521_v13, %v180_v57  ;;  %vm198_vm11 = vcmp.lt.s32.totalorder %v178_v46, 2 }
  0x9e   :  { %v187_v16 = vor.u32 %v186_v9, %v185_v61  ;;  %v190_v17 = vor.u32 %v189_v10, %v188_v3  ;;  %v193_v19 = vor.u32 %v192_v11, %v191_v4  ;;  %vm199_vm12 = vcmp.lt.s32.totalorder %v178_v46, 3 }
  0x9f   :  { %v122_v20 = vadd.s32 536870912, %v121_v12  ;;  %v196_v21 = vor.u32 %v195_v15, %v194_v6  ;;  %vm200_vm13 = vcmp.lt.s32.totalorder %v178_v46, 4  ;;  %v201_v22 = vsel %vm197_vm10, %v181_v51, %v184_v14 }
  0xa0   :  { %v202_v25 = vsel %vm200_vm13, %v190_v17, 2102212464  ;;  %v205_v26 = vsel %vm197_vm10, %v184_v14, %v187_v16  ;;  %v206_v28 = vsel %vm200_vm13, %v193_v19, 920167782  ;;  %v209_v29 = vsel %vm197_vm10, %v187_v16, %v190_v17 }
  0xa1   :  { %v1737_v0 = vshrl.u32 %v122_v20, 30  ;;  %v203_v30 = vsel %vm199_vm12, %v187_v16, %v202_v25  ;;  %v207_v13 = vsel %vm199_vm12, %v190_v17, %v206_v28  ;;  %v210_v31 = vsel %vm200_vm13, %v196_v21, 1326507024 }
  0xa2   :  { %v204_v33 = vsel %vm198_vm11, %v201_v22, %v203_v30  ;;  %v208_v35 = vsel %vm198_vm11, %v205_v26, %v207_v13  ;;  %v211_v36 = vsel %vm199_vm12, %v193_v19, %v210_v31  ;;  %v289_v38 = vshll.u32 %v1517_v60, %v1660_v48 }
  0xa3   :  { %v124_v39 = vshll.u32 %v1737_v0, 30  ;;  %v212_v40 = vsel %vm198_vm11, %v209_v29, %v211_v36  ;;  %v1746_v42 = vmul.u32.u64.low %v1677_v5, %v208_v35  ;;  %v1747_v43 = vmul.u32.u64.high %v1677_v5, %v208_v35, %v1746_v42 }
  0xa4   :  { %v1751_v47 = vmul.u32.u64.low %v1677_v5, %v212_v40  ;;  %v1752_v55 = vmul.u32.u64.high %v1677_v5, %v212_v40, %v1751_v47  ;;  %v288_v57 = vor.u32 %v287_v63, %v286_v56  ;;  %v290_v59 = vshrl.u32 %v1518_v62, %v1668_v54 }
  0xa5   :  { %v314_v60 = vsel %vm304_vm8, %v300_v49, 1326507024  ;;  %v1758_v61 = vsub.s32 %v121_v12, %v124_v39  ;;  %v292_v46 = vshll.u32 %v1518_v62, %v1660_v48  ;;  %v293_v1 = vshrl.u32 %v1520_v2, %v1668_v54 }
  0xa6   :  { %v220_v3 = vmul.u32 %v1677_v5, %v204_v33  ;;  %v285_v4 = vshrl.u32 %v1516_v58, %v1668_v54  ;;  %v291_v56 = vor.u32 %v290_v59, %v289_v38  ;;  %vm301_vm14 = vcmp.lt.s32.totalorder %v1665_v53, 1 }
  0xa7   :  { %v127_v63 = vsub.s32 0, %v1758_v61  ;;  %v223_v49 = vadd.s32 1, %v1747_v43  ;;  %v294_v6 = vor.u32 %v293_v1, %v292_v46  ;;  %vm303_vm15 = vcmp.lt.s32.totalorder %v1665_v53, 3 }
  0xa8   :  { %vm222_vm1 = vc.u32 %v1752_v55, %v1746_v42  ;;  %vm302_vm2 = vcmp.lt.s32.totalorder %v1665_v53, 2  ;;  %v309_v48 = vsel %vm301_vm14, %v288_v57, %v291_v56  ;;  %v315_v54 = vsel %vm303_vm15, %v1690_v18, %v314_v60 }
  0xa9   :  { %v1300_v58 = vmin.u32 %v127_v63, %v1758_v61  ;;  %v224_v62 = vsel %vm222_vm1, %v223_v49, %v1747_v43  ;;  %v306_v2 = vsel %vm304_vm8, %v294_v6, 2102212464  ;;  %v311_v5 = vsel %vm303_vm15, %v294_v6, %v1713_v50 }
  0xaa   :  { %v225_v51 = vadd.s32 %v224_v62, %v220_v3  ;;  %v312_v7 = vsel %vm302_vm2, %v309_v48, %v311_v5  ;;  %v313_v8 = vsel %vm301_vm14, %v291_v56, %v294_v6  ;;  %v317_v18 = vshll.u32 %v277_v52, 8 }
  0xab   :  { %v129_v9 = vclz %v1300_v58  ;;  %v305_v10 = vsel %vm301_vm14, %v285_v4, %v288_v57  ;;  %v316_v11 = vsel %vm302_vm2, %v313_v8, %v315_v54  ;;  %v307_v50 = vsel %vm303_vm15, %v291_v56, %v306_v2 }
  0xac   :  { %v226_v12 = vadd.s32 536870912, %v225_v51  ;;  %v1798_v14 = vmul.u32.u64.low %v317_v18, %v316_v11  ;;  %v1799_v15 = vmul.u32.u64.high %v317_v18, %v316_v11, %v1798_v14  ;;  %v308_v52 = vsel %vm302_vm2, %v305_v10, %v307_v50 }
  0xad   :  { %v1301_v16 = vadd.s32 4294967294, %v129_v9  ;;  %v1801_v17 = vmul.u32.u64.low %v317_v18, %v312_v7  ;;  %v1802_v19 = vmul.u32.u64.high %v317_v18, %v312_v7, %v1801_v17  ;;  %v324_v28 = vmul.u32 %v317_v18, %v308_v52 }
  0xae   :  { %v1804_v44 = vshrl.u32 %v226_v12, 30  ;;  %v117_v39 = vadd.s32 %v1700_v41, %v1706_v45  ;;  %v221_v3 = vadd.s32 %v1746_v42, %v1752_v55  ;;  %vm63_vm7 = vcmp.lt.s32.totalorder %v1639_v24, 0 }
  0xaf   :  { %vm1302_vm3 = vcmp.lt.s32.totalorder %v1301_v16, 0  ;;  %vm326_vm4 = vc.u32 %v1799_v15, %v1801_v17  ;;  %v327_v25 = vadd.s32 1, %v1802_v19  ;;  %v325_v9 = vadd.s32 %v1801_v17, %v1799_v15 }
  0xb0   :  { %v132_v20 = vsel %vm1302_vm3, 0, %v1301_v16  ;;  %v228_v21 = vshll.u32 %v1804_v44, 30  ;;  %vm167_vm8 = vcmp.lt.s32.totalorder %v1647_v32, 0  ;;  %vm1827_vm9 = vcmp.le.f32.partialorder %v165_v37, 0.7853982 }
  0xb1   :  { %v137_v22 = vsub.s32 4294967266, %v132_v20  ;;  %v328_v29 = vsel %vm326_vm4, %v327_v25, %v1802_v19  ;;  %v133_v36 = vsub.s32 32, %v132_v20  ;;  %v134_v60 = vshll.u32 %v1758_v61, %v132_v20 }
  0xb2   :  { %v229_v26 = vsub.s32 %v225_v51, %v228_v21  ;;  %v329_v13 = vadd.s32 %v328_v29, %v324_v28  ;;  %vm1838_vm10 = vcmp.le.f32.partialorder %v61_v27, 0.7853982  ;;  %v147_v28 = vsub.s32 4, %v1737_v0 }
  0xb3   :  { %v138_v31 = vadd.s32 127, %v137_v22  ;;  %v135_v57 = vshrl.u32 %v117_v39, %v133_v36  ;;  %vm271_vm11 = vcmp.lt.s32.totalorder %v1637_v23, 0  ;;  %vm270_vm12 = vcmp.le.f32.partialorder %v269_v34, 0.7853982 }
  0xb4   :  { %v231_v30 = vsub.s32 0, %v229_v26  ;;  %v330_v35 = vadd.s32 536870912, %v329_v13  ;;  %v148_v27 = vsel %vm63_vm7, %v147_v28, %v1737_v0  ;;  %v375_v28 = vld [vmem:[%s1966_s3 + $0x10] sm:$0xff] }
  0xb5   :  { %v139_v40 = vshll.u32 %v138_v31, 23  ;;  %v136_v49 = vor.u32 %v135_v57, %v134_v60  ;;  %v150_v39 = vsel %vm1838_vm10, 0, %v148_v27  ;;  %v910_v27 = vpop.permute.xlu1 %909 }
  0xb6   :  { %v1304_v33 = vmin.u32 %v231_v30, %v229_v26  ;;  %v1812_v38 = vshrl.u32 %v330_v35, 30 }
  0xb7   :  { %v140_v46 = vor.u32 4788187, %v139_v40  ;;  %v143_v5 = vcvt.s32.f32 %v136_v49 }
  0xb8   :  { %v233_v53 = vclz %v1304_v33  ;;  %v332_v47 = vshll.u32 %v1812_v38, 30  ;;  %v355_v35 = vsub.s32 4, %v1812_v38 }
  0xb9   :  { %v141_v54 = vand.u32 2147483647, %v140_v46 }
  0xba   :  { %v1305_v43 = vadd.s32 4294967294, %v233_v53  ;;  %v333_v59 = vsub.s32 %v329_v13, %v332_v47  ;;  %v251_v13 = vsub.s32 4, %v1804_v44  ;;  %v356_v40 = vsel %vm271_vm11, %v355_v35, %v1812_v38 }
  0xbb   :  { %v144_v7 = vmul.f32 %v143_v5, %v141_v54  ;;  %v154_v47 = vadd.s32 3, %v150_v39  ;;  %v358_v57 = vsel %vm270_vm12, 0, %v356_v40 }
  0xbc   :  { %vm1306_vm5 = vcmp.lt.s32.totalorder %v1305_v43, 0  ;;  %v335_v63 = vsub.s32 0, %v333_v59  ;;  %v252_v36 = vsel %vm167_vm8, %v251_v13, %v1804_v44  ;;  %v1863_v44 = vand.u32 3, %v150_v39 }
  0xbd   :  { %v236_v1 = vsel %vm1306_vm5, 0, %v1305_v43  ;;  %v145_v12 = vxor.u32 2147483648, %v144_v7  ;;  %v254_v43 = vsel %vm1827_vm9, 0, %v252_v36  ;;  %v1865_v34 = vand.u32 3, %v154_v47  ;;  %v905_v36 = vpop.permute.xlu0 %904 }
  0xbe   :  { %v237_v4 = vsub.s32 32, %v236_v1  ;;  %v241_v56 = vsub.s32 4294967266, %v236_v1  ;;  %v238_v6 = vshll.u32 %v229_v26, %v236_v1  ;;  %v1308_v48 = vmin.u32 %v335_v63, %v333_v59  ;;  %v58_v26 = vld [vmem:[%s1965_s2 + $0x8] sm:$0xff] }
  0xbf   :  { %v146_v17 = vsel %vm63_vm7, %v145_v12, %v144_v7  ;;  %v362_v1 = vadd.s32 3, %v358_v57  ;;  %v676_v63 = vand.u32 3, %v358_v57  ;;  %vm472_vm13 = vcmp.eq.s32.totalorder %v1863_v44, 0 }
  0xc0   :  { %v239_v41 = vshrl.u32 %v221_v3, %v237_v4  ;;  %v242_v45 = vadd.s32 127, %v241_v56  ;;  %v337_v2 = vclz %v1308_v48  ;;  %v149_v30 = vsel %vm1838_vm10, %v1639_v24, %v146_v17 }
  0xc1   :  { %v573_v3 = vand.u32 3, %v254_v43  ;;  %vm475_vm15 = vcmp.eq.s32.totalorder %v1863_v44, 2  ;;  %vm157_vm1 = vcmp.eq.s32.totalorder %v1865_v34, 0  ;;  %vm677_vm10 = vcmp.lt.s32.totalorder %v676_v63, 2 }
  0xc2   :  { %v240_v58 = vor.u32 %v239_v41, %v238_v6  ;;  %v243_v62 = vshll.u32 %v242_v45, 23  ;;  %v1309_v61 = vadd.s32 4294967294, %v337_v2  ;;  %v363_v41 = vand.u32 3, %v362_v1 }
  0xc3   :  { %vm574_vm4 = vcmp.lt.s32.totalorder %v573_v3, 2  ;;  %vm575_vm5 = vcmp.eq.s32.totalorder %v573_v3, 0  ;;  %vm681_vm0 = vcmp.eq.s32.totalorder %v676_v63, 2 }
  0xc4   :  { %v244_v51 = vor.u32 4788187, %v243_v62  ;;  %v247_v18 = vcvt.s32.f32 %v240_v58  ;;  %vm1310_vm6 = vcmp.lt.s32.totalorder %v1309_v61, 0  ;;  %vm364_vm14 = vcmp.lt.s32.totalorder %v363_v41, 2 }
  0xc5   :  { %v340_v42 = vsel %vm1310_vm6, 0, %v1309_v61  ;;  %vm578_vm6 = vcmp.eq.s32.totalorder %v573_v3, 2  ;;  %vm365_vm3 = vcmp.eq.s32.totalorder %v363_v41, 0  ;;  %vm368_vm2 = vcmp.eq.s32.totalorder %v363_v41, 2  ;;  %v895_v3 = vpop.permute.xlu0 %894  ;;  %v923_v41 = vld [vmem:[%s1968_s5 + $0x18] sm:$0xff] }
  0xc6   :  { %v245_v8 = vand.u32 2147483647, %v244_v51  ;;  %v341_v10 = vsub.s32 32, %v340_v42  ;;  %v345_v11 = vsub.s32 4294967266, %v340_v42  ;;  %v342_v14 = vshll.u32 %v333_v59, %v340_v42 }
  0xc7   :  { %v258_v59 = vadd.s32 3, %v254_v43 }
  0xc8   :  { %v248_v55 = vmul.f32 %v247_v18, %v245_v8  ;;  %v343_v16 = vshrl.u32 %v325_v9, %v341_v10  ;;  %v346_v19 = vadd.s32 127, %v345_v11 }
  0xc9   :  { %v259_v4 = vand.u32 3, %v258_v59 }
  0xca   :  { %v249_v50 = vxor.u32 2147483648, %v248_v55  ;;  %v344_v20 = vor.u32 %v343_v16, %v342_v14  ;;  %v347_v21 = vshll.u32 %v346_v19, 23 }
  0xcb   :  { %vm260_vm7 = vcmp.lt.s32.totalorder %v259_v4, 2 }
  0xcc   :  { %v250_v52 = vsel %vm167_vm8, %v249_v50, %v248_v55  ;;  %v348_v25 = vor.u32 4788187, %v347_v21  ;;  %v351_v29 = vcvt.s32.f32 %v344_v20  ;;  %vm261_vm8 = vcmp.eq.s32.totalorder %v259_v4, 0 }
  0xcd   :  { %v253_v22 = vsel %vm1827_vm9, %v1647_v32, %v250_v52  ;;  %vm160_vm9 = vcmp.eq.s32.totalorder %v1865_v34, 2 }
  0xce   :  { %v349_v37 = vand.u32 2147483647, %v348_v25  ;;  %1473 = vcosq.f32 %v253_v22 }
  0xcf   :  { %1475 = vsinq.f32 %v253_v22 }
  0xd0   :  { %v352_v31 = vmul.f32 %v351_v29, %v349_v37  ;;  %1477 = vcosq.f32 %v149_v30  ;;  %v376_v37 = vld [vmem:[%s1966_s3 + $0x18] sm:$0xff] }
  0xd1   :  { %1479 = vsinq.f32 %v149_v30  ;;  %v60_v29 = vld [vmem:[%s1965_s2 + $0x18] sm:$0xff]  ;;  %v920_v30 = vld [vmem:[%s1968_s5] sm:$0xff] }
  0xd2   :  { %v353_v33 = vxor.u32 2147483648, %v352_v31 }
  0xd4   :  { %v354_v53 = vsel %vm271_vm11, %v353_v33, %v352_v31  ;;  %vm678_vm11 = vcmp.eq.s32.totalorder %v676_v63, 0 }
  0xd5   :  { %v357_v0 = vsel %vm270_vm12, %v1637_v23, %v354_v53  ;;  %vm264_vm12 = vcmp.eq.s32.totalorder %v259_v4, 2 }
  0xd6   :  { %1481 = vcosq.f32 %v357_v0 }
  0xd7   :  { %1483 = vsinq.f32 %v357_v0 }
  0xdb   :  { %v1474_v60 = vpop.eup %1473 }
  0xdc   :  { %v1476_v46 = vpop.eup %1475  ;;  %v265_v6 = vxor.u32 2147483648, %v1474_v60 }
  0xdd   :  { %v1478_v56 = vpop.eup %1477  ;;  %v262_v49 = vxor.u32 2147483648, %v1476_v46 }
  0xde   :  { %v1480_v38 = vpop.eup %1479  ;;  %v161_v45 = vxor.u32 2147483648, %v1478_v56  ;;  %v580_v62 = vsel %vm578_vm6, %v265_v6, %v1476_v46  ;;  %v266_v5 = vsel %vm264_vm12, %v265_v6, %v1476_v46  ;;  %v922_v6 = vld [vmem:[%s1968_s5 + $0x10] sm:$0xff] }
  0xdf   :  { %v158_v48 = vxor.u32 2147483648, %v1480_v38  ;;  %v577_v58 = vsel %vm575_vm5, %v1474_v60, %v262_v49  ;;  %v263_v2 = vsel %vm261_vm8, %v1474_v60, %v262_v49  ;;  %vm1986_vm8 = vcmask 146432   ;;  %v900_v60 = vpop.permute.xlu1 %899  ;;  %v921_v49 = vld [vmem:[%s1968_s5 + $0x8] sm:$0xff] }
  0xe0   :  { %v477_v8 = vsel %vm475_vm15, %v161_v45, %v1480_v38  ;;  %v162_v18 = vsel %vm160_vm9, %v161_v45, %v1480_v38  ;;  %v581_v9 = vsel %vm574_vm4, %v577_v58, %v580_v62  ;;  %v267_v10 = vsel %vm260_vm7, %v263_v2, %v266_v5  ;;  %vm1987_vm9 = vmmov %vm1986_vm8  ;;  %v1337_v45 = vld [vmem:[%s1968_s5 + $0x20] sm:$0xff]  ;;  %v941_v58 = vpop.permute.xlu0 %940 }
  0xe1   :  { %v474_v50 = vsel %vm472_vm13, %v1478_v56, %v158_v48  ;;  %v159_v14 = vsel %vm157_vm1, %v1478_v56, %v158_v48  ;;  %vm471_vm15 = vcmp.lt.s32.totalorder %v1863_v44, 2  ;;  %vm1982_vm1 = vcmask 1041408   ;;  %vm1990_vm12 = vmmov %vm1986_vm8 }
  0xe2   :  { %vm1983_vm5 = vmmov %vm1982_vm1  ;;  %v478_v17 = vsel %vm471_vm15, %v474_v50, %v477_v8  ;;  %vm153_vm7 = vweird.f32 %v1639_v24  ;;  %v59_v24 = vld [vmem:[%s1965_s2 + $0x10] sm:$0xff] }
  0xe3   :  { %v1482_v54 = vpop.eup %1481  ;;  %vm1985_vm6 = vmmov %vm1982_vm1  ;;  %v946_v48 = vpop.permute.xlu1 %945  ;;  %v1339_v50 = vld [vmem:[%s1968_s5 + $0x30] sm:$0xff] }
  0xe4   :  { %v1484_v51 = vpop.eup %1483  ;;  %v369_v61 = vxor.u32 2147483648, %v1482_v54  ;;  %vm1991_vm15 = vmmov %vm1986_vm8 }
  0xe5   :  { %v366_v7 = vxor.u32 2147483648, %v1484_v51 }
  0xe6   :  { %v683_v42 = vsel %vm681_vm0, %v369_v61, %v1484_v51  ;;  %v370_v55 = vsel %vm368_vm2, %v369_v61, %v1484_v51  ;;  %vm156_vm0 = vcmp.lt.s32.totalorder %v1865_v34, 2  ;;  %vm1978_vm2 = vweird.f32 %v1637_v23 }
  0xe7   :  { %v680_v11 = vsel %vm678_vm11, %v1482_v54, %v366_v7  ;;  %v367_v12 = vsel %vm365_vm3, %v1482_v54, %v366_v7  ;;  %vm1979_vm4 = vmmov %vm1978_vm2  ;;  %vm1980_vm3 = vweird.f32 %v1647_v32  ;;  %v163_v22 = vsel %vm156_vm0, %v159_v14, %v162_v18  ;;  %v374_v32 = vld [vmem:[%s1966_s3 + $0x8] sm:$0xff]  ;;  %v936_v51 = vpop.permute.xlu1 %935  ;;  %v1340_v14 = vld [vmem:[%s1968_s5 + $0x38] sm:$0xff] }
  0xe8   :  { %v684_v16 = vsel %vm677_vm10, %v680_v11, %v683_v42  ;;  %v371_v19 = vsel %vm364_vm14, %v367_v12, %v370_v55  ;;  %v582_v21 = vsel %vm1980_vm3, nan, %v581_v9  ;;  %vm1981_vm13 = vmmov %vm1980_vm3  ;;  %v479_v23 = vsel %vm153_vm7, nan, %v478_v17  ;;  %v931_v42 = vpop.permute.xlu0 %930  ;;  %v1338_v12 = vld [vmem:[%s1968_s5 + $0x28] sm:$0xff] }
  0xe9   :  { %v685_v52 = vsel %vm1978_vm2, nan, %v684_v16  ;;  %v372_v20 = vsel %vm1979_vm4, nan, %v371_v19  ;;  %v268_v15 = vsel %vm1981_vm13, nan, %v267_v10  ;;  %vm1984_vm14 = vmmov %vm1982_vm1  ;;  %v164_v25 = vsel %vm153_vm7, nan, %v163_v22 }
  0xea   :  { %1386 = vmatprep.subr.msk.mxu0 %vm1982_vm1, %v685_v52  ;;  %1398 = vmatprep.subr.msk.mxu1 %vm1983_vm5, %v372_v20  ;;  %vm1988_vm10 = vmmov %vm1986_vm8  ;;  %vm948_vm0 = vcmask 261120   ;;  %v1522_v16 = vmov 0.0   ;;  %vm1523_vm2 = vmmov 0  }
  0xeb   :  { %1387 = vmatpush3.msk.msra.mxu0 %vm1984_vm14, %v685_v52  ;;  %1399 = vmatpush3.msk.msra.mxu1 %vm1985_vm6, %v372_v20  ;;  %vm1989_vm11 = vmmov %vm1986_vm8  ;;  %v1078_v19 = vpop.permute.xlu1 %1077 }
  0xec   :  { %1388 = vmatprep.subr.mxu0 %v582_v21  ;;  %1400 = vmatprep.subr.mxu1 %v268_v15  ;;  %v1073_v20 = vpop.permute.xlu0 %1072 }
  0xed   :  { %1389 = vmatpush3.msra.mxu0 %v582_v21  ;;  %1401 = vmatpush3.msra.mxu1 %v268_v15 }
  0xee   :  { %1390 = vmatprep.subr.mxu0 %v479_v23  ;;  %1402 = vmatprep.subr.mxu1 %v164_v25 }
  0xef   :  { %1391 = vmatpush3.msra.mxu0 %v479_v23  ;;  %1403 = vmatpush3.msra.mxu1 %v164_v25  ;;  %v1068_v22 = vpop.permute.xlu1 %1067 }
  0xf0   :  { %1393 = vmatmul.mubr.msk.f32.vlgmr.msra.gmra.mxu0 %vm1986_vm8, %v374_v32  ;;  %1405 = vmatmul.mubr.msk.f32.vlgmr.msra.gmra.mxu1 %vm1987_vm9, %v58_v26 }
  0xf1   :  { %1395 = vmatprep.mubr.msk.f32.mxu0 %vm1988_vm10, %v375_v28  ;;  %1407 = vmatprep.mubr.msk.f32.mxu1 %vm1989_vm11, %v59_v24  ;;  %v1063_v28 = vpop.permute.xlu0 %1062 }
  0xf4   :  { %1396 = vmatmul.mubr.msk.f32.gmra.mxu0 %vm1990_vm12, %v376_v37  ;;  %1408 = vmatmul.mubr.msk.f32.gmra.mxu1 %vm1991_vm15, %v60_v29 }
  0xf5   :  { %1418 = vmatprep.mubr.msk.f32.mxu0 %vm948_vm0, %v920_v30  ;;  %1432 = vmatprep.mubr.msk.f32.mxu1 %vm948_vm0, %v1337_v45 }
 0x1b0   :  { %v1394_v13 = vpop.f32.mrf.mxu0  ;;  %v1406_v31 = vpop.f32.mrf.mxu1 }
 0x1b1   :  { %v875_v0 = vadd.f32 %v1406_v31, %v1394_v13  ;;  %v1181_v13 = vld [vmem:[%s1970_s7] sm:$0xf]  ;;  %v1186_v31 = vpop.permute.xlu1 %1185  ;;  %s1524_s7 = smov [#allocation2]  }
 0x1b2   :  { %v769_v33 = vpop.f32.mrf.mxu0  ;;  %v869_v35 = vpop.f32.mrf.mxu1  ;;  %s1291_s25 = sshll.u32 %s1524_s7, 4  ;;  %s1292_s25 = int_to_ptr.vmem [resolvable:$true] %s1291_s25 }
 0x1b3   :  { %v870_v57 = vadd.f32 %v869_v35, %v769_v33  ;;  %v913_v34 = vadd.f32 %v900_v60, %v875_v0  ;;  %s1493_s26 = scalar_lea.vmem %s1292_s25, 64  ;;  %p1498_p1 = scmp.lt.s32.totalorder %s1292_s25, %s1292_s25 }
 0x1b4   :  { %v1397_v53 = vpop.f32.mrf.mxu0  ;;  %v1409_v39 = vpop.f32.mrf.mxu1  ;;  %p1494_p0 = scmp.ne.s32.totalorder %s1292_s25, %s1493_s26  ;;  %p1499_p2 = scmp.lt.s32.totalorder %s1493_s26, %s1493_s26 }
 0x1b5   :  { %v885_v40 = vadd.f32 %v1409_v39, %v1397_v53  ;;  %v912_v4 = vadd.f32 %v895_v3, %v870_v57  ;;  %v917_v63 = vmax.f32 %v913_v34, 0.0  ;;  %v1261_v57 = vlaneseq }
 0x1b6   :  { %v779_v43 = vpop.f32.mrf.mxu0  ;;  %v879_v47 = vpop.f32.mrf.mxu1  ;;  %p1500_p3 = por %p1499_p2, %p1498_p1 }
 0x1b7   :  { %v915_v59 = vadd.f32 %v910_v27, %v885_v40  ;;  %v880_v44 = vadd.f32 %v879_v47, %v779_v43  ;;  %v916_v38 = vmax.f32 %v912_v4, 0.0 }
 0x1b8   :  { %p1501_p4 = pnand %p1500_p3, %p1494_p0 }
 0x1b9   :  { %v919_v46 = vmax.f32 %v915_v59, 0.0  ;;  %v914_v1 = vadd.f32 %v905_v36, %v880_v44  ;;  %v1262_v44 = vshrl.u32 %v1261_v57, 7 }
 0x1bb   :  { %v918_v56 = vmax.f32 %v914_v1, 0.0  ;;  %1410 = vmatprep.subr.mxu0 %v919_v46  ;;  %vm1282_vm3 = vcmp.eq.s32.totalorder %v1262_v44, 3 }
 0x1bc   :  { %1411 = vmatpush3.msra.mxu0 %v919_v46 }
 0x1bd   :  { %1412 = vmatprep.subr.mxu0 %v918_v56 }
 0x1be   :  { %1413 = vmatpush3.msra.mxu0 %v918_v56 }
 0x1bf   :  { %1414 = vmatprep.subr.mxu0 %v917_v63 }
 0x1c0   :  { %1415 = vmatpush3.msra.mxu0 %v917_v63 }
 0x1c1   :  { %1416 = vmatprep.subr.mxu0 %v916_v38 }
 0x1c2   :  { %1417 = vmatpush3.msra.mxu0 %v916_v38 }
 0x1c3   :  { %1419 = vmatmul.mubr.msk.f32.vlgmr.msra.gmra.mxu0 %vm948_vm0, %v921_v49  ;;  %1438 = vmatprep.subr.mxu0 %v1522_v16 }
 0x1c4   :  { %1421 = vmatprep.mubr.msk.f32.mxu0 %vm948_vm0, %v922_v6 }
 0x1c7   :  { %1422 = vmatmul.mubr.msk.f32.gmra.mxu0 %vm948_vm0, %v923_v41 }
 0x1c8   :  { %1446 = vmatprep.mubr.msk.f32.mxu0 %vm1523_vm2, %v1522_v16 }
 0x283   :  { %v1420_v54 = vpop.f32.mrf.mxu0 }
 0x284   :  { %v1033_v7 = vadd.f32 %v1420_v54, %v936_v51 }
 0x285   :  { %v1027_v62 = vpop.f32.mrf.mxu0 }
 0x286   :  { %v1028_v55 = vadd.f32 %v1027_v62, %v931_v42  ;;  %v1047_v10 = vmax.f32 %v1033_v7, 0.0 }
 0x287   :  { %v1423_v2 = vpop.f32.mrf.mxu0 }
 0x288   :  { %v1043_v5 = vadd.f32 %v1423_v2, %v946_v48  ;;  %v1046_v11 = vmax.f32 %v1028_v55, 0.0 }
 0x289   :  { %v1037_v61 = vpop.f32.mrf.mxu0 }
 0x28a   :  { %v1049_v8 = vmax.f32 %v1043_v5, 0.0  ;;  %v1038_v18 = vadd.f32 %v1037_v61, %v941_v58 }
 0x28c   :  { %v1048_v9 = vmax.f32 %v1038_v18, 0.0  ;;  %1424 = vmatprep.subr.mxu1 %v1049_v8 }
 0x28d   :  { %1425 = vmatpush3.msra.mxu1 %v1049_v8 }
 0x28e   :  { %1426 = vmatprep.subr.mxu1 %v1048_v9 }
 0x28f   :  { %1427 = vmatpush3.msra.mxu1 %v1048_v9 }
 0x290   :  { %1428 = vmatprep.subr.mxu1 %v1047_v10 }
 0x291   :  { %1429 = vmatpush3.msra.mxu1 %v1047_v10 }
 0x292   :  { %1430 = vmatprep.subr.mxu1 %v1046_v11 }
 0x293   :  { %1431 = vmatpush3.msra.mxu1 %v1046_v11 }
 0x294   :  { %1433 = vmatmul.mubr.msk.f32.vlgmr.msra.gmra.mxu1 %vm948_vm0, %v1338_v12 }
 0x295   :  { %1435 = vmatprep.mubr.msk.f32.mxu1 %vm948_vm0, %v1339_v50 }
 0x298   :  { %1436 = vmatmul.mubr.msk.f32.gmra.mxu1 %vm948_vm0, %v1340_v14 }
 0x354   :  { %v1434_v52 = vpop.f32.mrf.mxu1 }
 0x355   :  { %v1164_v25 = vadd.f32 %v1434_v52, %v1068_v22 }
 0x356   :  { %v1158_v21 = vpop.f32.mrf.mxu1 }
 0x357   :  { %v1159_v24 = vadd.f32 %v1158_v21, %v1063_v28  ;;  %v1178_v29 = vmax.f32 %v1164_v25, 0.0 }
 0x358   :  { %v1437_v15 = vpop.f32.mrf.mxu1 }
 0x359   :  { %v1174_v17 = vadd.f32 %v1437_v15, %v1078_v19  ;;  %v1177_v30 = vmax.f32 %v1159_v24, 0.0 }
 0x35a   :  { %v1168_v23 = vpop.f32.mrf.mxu1 }
 0x35b   :  { %v1180_v32 = vmax.f32 %v1174_v17, 0.0  ;;  %v1169_v26 = vadd.f32 %v1168_v23, %v1073_v20 }
 0x35d   :  { %v1179_v37 = vmax.f32 %v1169_v26, 0.0  ;;  %1439 = vmatpush3.msra.mxu0 %v1180_v32 }
 0x35e   :  { %1440 = vmatprep.subr.mxu0 %v1522_v16 }
 0x35f   :  { %1441 = vmatpush3.msra.mxu0 %v1179_v37 }
 0x360   :  { %1442 = vmatprep.subr.mxu0 %v1522_v16 }
 0x361   :  { %1443 = vmatpush3.msra.mxu0 %v1178_v29 }
 0x362   :  { %1444 = vmatprep.subr.mxu0 %v1522_v16 }
 0x363   :  { %1445 = vmatpush3.msra.mxu0 %v1177_v30 }
 0x364   :  { %1447 = vmatmul.mubr.msk.f32.vlgmr.msra.gmra.mxu0 %vm948_vm0, %v1181_v13 }
 0x424   :  { %v1257_v27 = vpop.f32.mrf.mxu0 }
 0x425   :  { %v1258_v33 = vadd.f32 %v1257_v27, %v1186_v31 }
 0x426   :  { %v1448_v35 = vpop.f32.mrf.mxu0 }
 0x427   :  { %v1350_v36 = vmul.f32 -1.442695, %v1258_v33  ;;  %v1270_v53 = vmul.f32 1.442695, %v1258_v33  ;;  %vm1269_vm13 = vcmp.gt.f32.partialorder %v1258_v33, 20.0 }
 0x429   :  { %1485 = vpow2.f32 %v1350_v36 }
 0x42a   :  { %1487 = vpow2.f32 %v1270_v53 }
 0x436   :  { %v1486_v39 = vpop.eup %1485 }
 0x437   :  { %v1488_v0 = vpop.eup %1487  ;;  %v1266_v43 = vadd.f32 1.0, %v1486_v39 }
 0x438   :  { %v1272_v40 = vadd.f32 1.0, %v1488_v0  ;;  %v1275_v47 = vmul.f32 -0.5, %v1488_v0  ;;  %v1278_v60 = vand.u32 2147483647, %v1488_v0 }
 0x43a   :  { %1489 = vlog2.f32 %v1272_v40  ;;  %v1276_v59 = vadd.f32 1.0, %v1275_v47  ;;  %vm1279_vm4 = vcmp.lt.f32.partialorder %v1278_v60, 0.0004427343 }
 0x43b   :  { %1491 = vrcp.f32 %v1266_v43 }
 0x43c   :  { %v1277_v1 = vmul.f32 %v1488_v0, %v1276_v59 }
 0x447   :  { %v1490_v34 = vpop.eup %1489 }
 0x448   :  { %v1274_v46 = vmul.f32 0.6931472, %v1490_v34  ;;  %v1492_v4 = vpop.eup %1491 }
 0x44a   :  { %v1280_v3 = vsel %vm1279_vm4, %v1277_v1, %v1274_v46 }
 0x44b   :  { %v1281_v56 = vsel %vm1269_vm13, %v1258_v33, %v1280_v3 }
 0x44c   :  { %v1283_v63 = vsel %vm1282_vm3, %v1281_v56, %v1492_v4 }
 0x44d   :  { %1284 = vst [vmem:[#allocation2] sm:$0xf] %v1283_v63 }
 0x44e   :  { %1504 = shalt.err (!%p1501_p4)
}
 0x44f   :  { %1294 = dma.vmem_to_hbm [thread:$0]  %s1292_s25, 64, %s1972_s9, [#allocation3]  }
 0x450   :  { %1513 = dma.done.wait [#allocation3], 64  }
 0x451   :  { %1514 = vsyncadd [#allocation3], 4294967232 }
 0x452   :  { %1298 = vsyncpa [#allocation3], 1 }

</bundles_post_ra>
